<compile_context>
chip_gen: v7x
topology: tpu7x:2x2x1
jax: 0.10.0
libtpu: 0.0.40
codegen_flags: <defaults>
</compile_context>

<pallas_src>
import jax
import jax.numpy as jnp
from jax.experimental import pallas as pl
from jax.experimental.pallas import tpu as pltpu

# Memory-space enum (name-compat across recent JAX versions).
_MEMSPACE = getattr(pltpu, "MemorySpace", None) or getattr(pltpu, "TPUMemorySpace")
_VMEM_SPACE = _MEMSPACE.VMEM


def _round_up(x, m):
    return (x + m - 1) // m * m


def _pick_tile(dim, candidates, fallback):
    for c in candidates:
        if dim % c == 0:
            return c
    return fallback


# ----------------------------------------------------------------------------
# Kernels
# ----------------------------------------------------------------------------
def _linear_sigmoid_whole_kernel(x_ref, w_ref, b_ref, o_ref):
    # Single-shot path: all operands already resident in VMEM.
    # bf16 feed to the MXU (cast happens on VMEM data -> free vs. HBM),
    # f32 accumulation, fused f32 bias add (VPU) + sigmoid (EUP) epilogue.
    x = x_ref[...].astype(jnp.bfloat16)
    w = w_ref[...].astype(jnp.bfloat16)
    z = jnp.dot(x, w, preferred_element_type=jnp.float32)
    z = z + b_ref[...]                      # (M, N) + (1, N) broadcast
    o_ref[...] = jax.nn.sigmoid(z).astype(o_ref.dtype)


def _linear_sigmoid_tiled_kernel(x_ref, w_ref, b_ref, o_ref, acc_ref):
    # Gridded path: (M-tiles, N-tiles, K-tiles); K is the reduction axis.
    k = pl.program_id(2)

    @pl.when(k == 0)
    def _():
        acc_ref[...] = jnp.zeros_like(acc_ref)

    acc_ref[...] += jnp.dot(x_ref[...].astype(jnp.bfloat16),
                            w_ref[...].astype(jnp.bfloat16),
                            preferred_element_type=jnp.float32)

    @pl.when(k == pl.num_programs(2) - 1)
    def _():
        z = acc_ref[...] + b_ref[...]
        o_ref[...] = jax.nn.sigmoid(z).astype(o_ref.dtype)


# ----------------------------------------------------------------------------
# Wrapper
# ----------------------------------------------------------------------------
def linear_sigmoid(x2d, w, b, *, force_tiled=False):
    """x2d: (M, K) f32, w: (K, N) f32, b: (1, N) f32 -> sigmoid(x2d @ w + b) f32."""
    M, K = x2d.shape
    Kw, N = w.shape
    assert Kw == K and b.shape == (1, N)

    # Exact HBM traffic of the fused call (f32 in, f32 out).
    footprint = 4 * (M * K + K * N + N + M * N)

    # ---- small-shape path: no grid, no padding, one launch -----------------
    if (not force_tiled) and footprint <= (12 << 20):
        cost = pl.CostEstimate(flops=2 * M * K * N,
                               transcendentals=M * N,
                               bytes_accessed=footprint)
        vmem_limit = int(min(max(2 * footprint, 4 << 20), 48 << 20))
        return pl.pallas_call(
            _linear_sigmoid_whole_kernel,
            out_shape=jax.ShapeDtypeStruct((M, N), jnp.float32),
            in_specs=[pl.BlockSpec(memory_space=_VMEM_SPACE)] * 3,
            out_specs=pl.BlockSpec(memory_space=_VMEM_SPACE),
            compiler_params=pltpu.CompilerParams(vmem_limit_bytes=vmem_limit),
            cost_estimate=cost,
        )(x2d, w, b)

    # ---- tiled path (large shapes): K-reduction grid + f32 accumulator -----
    M8 = _round_up(M, 8)                   # sublane-align rows (8 per tile)
    if M8 != M:
        x2d = jnp.pad(x2d, ((0, M8 - M), (0, 0)))

    # bm divides M8 exactly (no double padding for M slightly above 128).
    bm = _pick_tile(M8, (256, 128, 64, 32, 16, 8), M8)
    # bn: prefer 512/256 (full MXU passes on v6e/v7x); 128 is the v5e fallback.
    bn = _pick_tile(N, (512, 256, 128), N)
    bk = _pick_tile(K, (512, 256, 128), K)

    grid = (M8 // bm, N // bn, K // bk)

    # Double-buffered f32 blocks + f32 accumulator; keep headroom on v7x.
    block_bytes = 2 * 4 * (bm * bk + bk * bn + bn + bm * bn) + 4 * bm * bn
    vmem_limit = int(min(max(4 * block_bytes, 4 << 20), 48 << 20))

    cost = pl.CostEstimate(
        flops=2 * M8 * K * N,
        transcendentals=M8 * N,
        bytes_accessed=4 * (M8 * K * (N // bn) + K * N * (M8 // bm) + N + M8 * N))

    out = pl.pallas_call(
        _linear_sigmoid_tiled_kernel,
        out_shape=jax.ShapeDtypeStruct((M8, N), jnp.float32),
        grid=grid,
        in_specs=[
            pl.BlockSpec((bm, bk), lambda i, j, k: (i, k)),
            pl.BlockSpec((bk, bn), lambda i, j, k: (k, j)),
            pl.BlockSpec((1, bn), lambda i, j, k: (0, j)),
        ],
        out_specs=pl.BlockSpec((bm, bn), lambda i, j, k: (i, j)),
        scratch_shapes=[pltpu.VMEM((bm, bn), jnp.float32)],
        compiler_params=pltpu.CompilerParams(
            dimension_semantics=("parallel", "parallel", "arbitrary"),
            vmem_limit_bytes=vmem_limit),
        cost_estimate=cost,
    )(x2d, w, b)

    return out[:M] if M8 != M else out


def model_forward(x_nchw, w, b):
    """Reproduces: v1 = x.view(-1, H*W); v2 = Linear(v1); v3 = sigmoid(v2)."""
    B, C, H, W = x_nchw.shape
    F = H * W
    v1 = x_nchw.reshape(-1, F)              # (B*C, F) — plain-JAX glue
    return linear_sigmoid(v1, w, b)         # (B*C, F)


if __name__ == "__main__":
    key = jax.random.PRNGKey(0)
    k_x, k_w, k_b = jax.random.split(key, 3)

    # Small shapes consistent with the module: F = H*W = 256, M = B*C = 8.
    B, C, H, W = 2, 4, 16, 16
    F = H * W

    x1 = jax.random.normal(k_x, (B, C, H, W), dtype=jnp.float32)

    # Deterministic parameter init (PyTorch Linear-style uniform bound).
    bound = 1.0 / (F ** 0.5)
    w = jax.random.uniform(k_w, (F, F), dtype=jnp.float32,
                           minval=-bound, maxval=bound)   # (in, out) layout
    b = jax.random.uniform(k_b, (1, F), dtype=jnp.float32,
                           minval=-bound, maxval=bound)

    out = model_forward(x1, w, b)
    out = jax.block_until_ready(out)

    ref = jax.nn.sigmoid(x1.reshape(-1, F) @ w + b)
    assert out.shape == (B * C, F)
    # bf16 MXU feed with f32 accumulation -> loose tolerance vs f32 reference.
    assert jnp.allclose(out, ref, atol=2e-2, rtol=2e-2)

    # Also exercise the tiled (large-shape) path: M=16, K=N=1024 -> grid (1,2,2).
    Bt, Ct, Ht, Wt = 2, 8, 32, 32
    Ft = Ht * Wt
    bt_bound = 1.0 / (Ft ** 0.5)
    xt = jax.random.normal(k_x, (Bt, Ct, Ht, Wt), dtype=jnp.float32)
    wt = jax.random.uniform(k_w, (Ft, Ft), dtype=jnp.float32,
                            minval=-bt_bound, maxval=bt_bound)
    bt = jax.random.uniform(k_b, (1, Ft), dtype=jnp.float32,
                            minval=-bt_bound, maxval=bt_bound)
    out_t = linear_sigmoid(xt.reshape(-1, Ft), wt, bt, force_tiled=True)
    out_t = jax.block_until_ready(out_t)
    ref_t = jax.nn.sigmoid(xt.reshape(-1, Ft) @ wt + bt)
    assert out_t.shape == (Bt * Ct, Ft)
    assert jnp.allclose(out_t, ref_t, atol=2e-2, rtol=2e-2)

    print("KERNEL_OK")
</pallas_src>

<mosaic_0001>
module attributes {stable_mosaic.version = 11 : i64} {
  func.func @_linear_sigmoid_whole_kernel(%arg0: memref<8x256xf32, #tpu.memory_space<vmem>>, %arg1: memref<256x256xf32, #tpu.memory_space<vmem>>, %arg2: memref<1x256xf32, #tpu.memory_space<vmem>>, %arg3: memref<8x256xf32, #tpu.memory_space<vmem>>) attributes {dimension_semantics = [], scalar_prefetch = 0 : i64, scratch_operands = 0 : i64, tpu.core_type = #tpu.core_type<tc>} {
    %c0 = arith.constant 0 : index
    %c0_0 = arith.constant 0 : index
    %0 = vector.load %arg0[%c0, %c0_0] : memref<8x256xf32, #tpu.memory_space<vmem>>, vector<8x256xf32>
    %1 = arith.truncf %0 : vector<8x256xf32> to vector<8x256xbf16>
    %c0_1 = arith.constant 0 : index
    %c0_2 = arith.constant 0 : index
    %2 = vector.load %arg1[%c0_1, %c0_2] : memref<256x256xf32, #tpu.memory_space<vmem>>, vector<256x256xf32>
    %3 = arith.truncf %2 : vector<256x256xf32> to vector<256x256xbf16>
    %cst = arith.constant dense<0.000000e+00> : vector<8x256xf32>
    %4 = tpu.matmul %1, %3, %cst {dimension_numbers = #tpu.dot_dimension_numbers<[1], [0], [0], [1], [0, 0, 1, 1], [], []>} : vector<8x256xbf16>, vector<256x256xbf16>, vector<8x256xf32> -> vector<8x256xf32>
    %c0_3 = arith.constant 0 : index
    %c0_4 = arith.constant 0 : index
    %5 = vector.load %arg2[%c0_3, %c0_4] : memref<1x256xf32, #tpu.memory_space<vmem>>, vector<1x256xf32>
    %6 = vector.broadcast %5 : vector<1x256xf32> to vector<8x256xf32>
    %7 = arith.addf %4, %6 : vector<8x256xf32>
    %8 = arith.negf %7 : vector<8x256xf32>
    %9 = math.exp %8 : vector<8x256xf32>
    %cst_5 = arith.constant 1.000000e+00 : f32
    %10 = vector.broadcast %cst_5 : f32 to vector<8x256xf32>
    %11 = arith.addf %10, %9 : vector<8x256xf32>
    %12 = arith.divf %10, %11 : vector<8x256xf32>
    %c0_6 = arith.constant 0 : index
    %c0_7 = arith.constant 0 : index
    %13 = vector.load %arg3[%c0_6, %c0_7] : memref<8x256xf32, #tpu.memory_space<vmem>>, vector<8x256xf32>
    tpu.vector_store %arg3[%c0_6, %c0_7], %12 {strides = array<i32>} : memref<8x256xf32, #tpu.memory_space<vmem>>, vector<8x256xf32>,
    return
  }
}

</mosaic_0001>

<bundles_post_ra>
// kernel: tpu_custom_call.1
= control target key start
LH: loop header
LB: loop body
LE: loop exit
PB: predicated region body
PF: predicated region fallthrough
CT: control target
= control target key end

     0   :  { %8 = vsyncpa [#allocation3], 0  ;;  %s382_s0 = inlined_call_operand.hbm [shape: f32[8,256], index: 0, kind: input, shape index: {}]   ;;  %s383_s1 = inlined_call_operand.hbm [shape: f32[256,256], index: 1, kind: input, shape index: {}]   ;;  %s384_s2 = inlined_call_operand.vmem [shape: f32[1,256], index: 2, kind: input, shape index: {}]   ;;  %s385_s3 = inlined_call_operand.hbm [shape: f32[8,256], index: 3, kind: output, shape index: {}]  }
   0x1   :  { %9 = vsyncpa [#allocation6], 0 }
   0x2   :  { %10 = vsyncpa [#allocation4], 0  ;;  %s311_s12 = smov [#allocation2]   ;;  %s312_s14 = smov [#allocation5]  }
   0x3   :  { %s17_s13 = sshll.u32 %s311_s12, 4  ;;  %s26_s15 = sshll.u32 %s312_s14, 4  ;;  %s18_s13 = int_to_ptr.vmem [resolvable:$true] %s17_s13  ;;  %s336_s15 = int_to_ptr.vmem [resolvable:$true] %s26_s15 }
   0x4   :  { %s239_s18 = scalar_lea.hbm %s382_s0, 256 }
   0x5   :  { %p240_p0 = scmp.ne.s32.totalorder %s382_s0, %s239_s18  ;;  %p243_p1 = scmp.lt.u32.totalorder %s239_s18, %s382_s0 }
   0x7   :  { %p245_p2 = pnand %p243_p1, %p240_p0 }
   0x9   :  { %248 = shalt.err (!%p245_p2)
}
   0xa   :  { %s249_s23 = scalar_lea.vmem %s18_s13, 256  ;;  %p254_p4 = scmp.lt.s32.totalorder %s18_s13, %s18_s13 }
   0xb   :  { %p250_p3 = scmp.ne.s32.totalorder %s18_s13, %s249_s23  ;;  %p255_p5 = scmp.lt.s32.totalorder %s249_s23, %s249_s23 }
   0xd   :  { %p256_p6 = por %p255_p5, %p254_p4 }
   0xf   :  { %p257_p7 = pnand %p256_p6, %p250_p3 }
  0x11   :  { %260 = shalt.err (!%p257_p7)
}
  0x12   :  { %20 = dma.hbm_to_vmem [thread:$0]  %s382_s0, 256, %s18_s13, [#allocation3]  }
  0x13   :  { %s261_s28 = scalar_lea.hbm %s383_s1, 8192 }
  0x14   :  { %p262_p8 = scmp.ne.s32.totalorder %s383_s1, %s261_s28  ;;  %p265_p9 = scmp.lt.u32.totalorder %s261_s28, %s383_s1 }
  0x16   :  { %p267_p10 = pnand %p265_p9, %p262_p8 }
  0x18   :  { %270 = shalt.err (!%p267_p10)
}
  0x19   :  { %s271_s6 = scalar_lea.vmem %s336_s15, 8192  ;;  %p276_p12 = scmp.lt.s32.totalorder %s336_s15, %s336_s15 }
  0x1a   :  { %p272_p11 = scmp.ne.s32.totalorder %s336_s15, %s271_s6  ;;  %p277_p13 = scmp.lt.s32.totalorder %s271_s6, %s271_s6 }
  0x1c   :  { %p278_p0 = por %p277_p13, %p276_p12 }
  0x1e   :  { %p279_p1 = pnand %p278_p0, %p272_p11 }
  0x20   :  { %282 = shalt.err (!%p279_p1)
}
  0x21   :  { %s313_s0 = smov 256   ;;  %s314_s7 = smov 16  }
  0x22   :  { %32 = dma.hbm_to_vmem [thread:$0]  %s383_s1, 8192, %s336_s15, [#allocation6], %s313_s0, %s313_s0, %s314_s7  }
  0x23   :  { %305 = dma.done.wait [#allocation3], 256  }
  0x24   :  { %306 = vsyncadd [#allocation3], 4294967040 }
  0x25   :  { %307 = dma.done.wait [#allocation6], 8192  }
  0x26   :  { %308 = vsyncadd [#allocation6], 4294959104  ;;  %v46_v0 = vld [vmem:[#allocation5 + $0x8] sm:$0xff]  ;;  %v48_v1 = vld [vmem:[#allocation5 + $0x18] sm:$0xff] }
  0x27   :  { %v45_v2 = vld [vmem:[#allocation5] sm:$0xff]  ;;  %v110_v3 = vpack.c.bf16 %v48_v1, %v46_v0  ;;  %v47_v4 = vld [vmem:[#allocation5 + $0x10] sm:$0xff]  ;;  %v50_v5 = vld [vmem:[#allocation5 + $0x28] sm:$0xff] }
  0x28   :  { %v52_v6 = vld [vmem:[#allocation5 + $0x38] sm:$0xff]  ;;  %v109_v7 = vpack.c.bf16 %v47_v4, %v45_v2  ;;  %v49_v9 = vld [vmem:[#allocation5 + $0x20] sm:$0xff]  ;;  %v51_v10 = vld [vmem:[#allocation5 + $0x30] sm:$0xff] }
  0x29   :  { %v112_v8 = vpack.c.bf16 %v52_v6, %v50_v5  ;;  %v54_v11 = vld [vmem:[#allocation5 + $0x48] sm:$0xff]  ;;  %153 = vmatprep.subr.bf16.mxu0 %v110_v3  ;;  %v56_v12 = vld [vmem:[#allocation5 + $0x58] sm:$0xff]  ;;  %v111_v13 = vpack.c.bf16 %v51_v10, %v49_v9  ;;  %v53_v15 = vld [vmem:[#allocation5 + $0x40] sm:$0xff] }
  0x2a   :  { %154 = vmatpush1.bf16.msra.mxu0 %v109_v7  ;;  %v114_v14 = vpack.c.bf16 %v56_v12, %v54_v11  ;;  %v55_v16 = vld [vmem:[#allocation5 + $0x50] sm:$0xff]  ;;  %v58_v17 = vld [vmem:[#allocation5 + $0x68] sm:$0xff]  ;;  %v60_v18 = vld [vmem:[#allocation5 + $0x78] sm:$0xff] }
  0x2b   :  { %155 = vmatprep.subr.bf16.mxu0 %v112_v8  ;;  %v113_v19 = vpack.c.bf16 %v55_v16, %v53_v15  ;;  %v116_v20 = vpack.c.bf16 %v60_v18, %v58_v17  ;;  %v57_v21 = vld [vmem:[#allocation5 + $0x60] sm:$0xff]  ;;  %v59_v22 = vld [vmem:[#allocation5 + $0x70] sm:$0xff]  ;;  %v62_v23 = vld [vmem:[#allocation5 + $0x88] sm:$0xff] }
  0x2c   :  { %v64_v24 = vld [vmem:[#allocation5 + $0x98] sm:$0xff]  ;;  %v115_v25 = vpack.c.bf16 %v59_v22, %v57_v21  ;;  %v61_v27 = vld [vmem:[#allocation5 + $0x80] sm:$0xff]  ;;  %v63_v28 = vld [vmem:[#allocation5 + $0x90] sm:$0xff] }
  0x2d   :  { %v118_v26 = vpack.c.bf16 %v64_v24, %v62_v23  ;;  %v66_v29 = vld [vmem:[#allocation5 + $0xa8] sm:$0xff]  ;;  %v68_v30 = vld [vmem:[#allocation5 + $0xb8] sm:$0xff]  ;;  %v117_v31 = vpack.c.bf16 %v63_v28, %v61_v27  ;;  %v65_v33 = vld [vmem:[#allocation5 + $0xa0] sm:$0xff] }
  0x2e   :  { %156 = vmatpush1.bf16.msra.mxu0 %v111_v13  ;;  %v120_v32 = vpack.c.bf16 %v68_v30, %v66_v29  ;;  %v67_v34 = vld [vmem:[#allocation5 + $0xb0] sm:$0xff]  ;;  %v70_v35 = vld [vmem:[#allocation5 + $0xc8] sm:$0xff]  ;;  %v72_v36 = vld [vmem:[#allocation5 + $0xd8] sm:$0xff] }
  0x2f   :  { %157 = vmatprep.subr.bf16.mxu0 %v114_v14  ;;  %v119_v37 = vpack.c.bf16 %v67_v34, %v65_v33  ;;  %v122_v38 = vpack.c.bf16 %v72_v36, %v70_v35  ;;  %v69_v39 = vld [vmem:[#allocation5 + $0xc0] sm:$0xff]  ;;  %v71_v40 = vld [vmem:[#allocation5 + $0xd0] sm:$0xff]  ;;  %v42_v41 = vld [vmem:[#allocation2 + $0x8] sm:$0xff]  ;;  %v143_v36 = vlaneseq }
  0x30   :  { %v74_v42 = vld [vmem:[#allocation5 + $0xe8] sm:$0xff]  ;;  %v76_v43 = vld [vmem:[#allocation5 + $0xf8] sm:$0xff]  ;;  %v44_v44 = vpack.c.bf16 %v42_v41, %v42_v41  ;;  %v121_v45 = vpack.c.bf16 %v71_v40, %v69_v39  ;;  %v73_v47 = vld [vmem:[#allocation5 + $0xe0] sm:$0xff] }
  0x31   :  { %v124_v46 = vpack.c.bf16 %v76_v43, %v74_v42  ;;  %v75_v48 = vld [vmem:[#allocation5 + $0xf0] sm:$0xff]  ;;  %v78_v49 = vld [vmem:[#allocation5 + $0x108] sm:$0xff]  ;;  %v80_v50 = vld [vmem:[#allocation5 + $0x118] sm:$0xff] }
  0x32   :  { %158 = vmatpush1.bf16.msra.mxu0 %v113_v19  ;;  %185 = vmatprep.mubr.bf16.mxu0 %v44_v44  ;;  %v123_v51 = vpack.c.bf16 %v75_v48, %v73_v47  ;;  %v126_v52 = vpack.c.bf16 %v80_v50, %v78_v49  ;;  %v77_v53 = vld [vmem:[#allocation5 + $0x100] sm:$0xff]  ;;  %v79_v54 = vld [vmem:[#allocation5 + $0x110] sm:$0xff]  ;;  %v82_v55 = vld [vmem:[#allocation5 + $0x128] sm:$0xff] }
  0x33   :  { %159 = vmatprep.subr.bf16.mxu0 %v116_v20  ;;  %v84_v56 = vld [vmem:[#allocation5 + $0x138] sm:$0xff]  ;;  %v125_v57 = vpack.c.bf16 %v79_v54, %v77_v53  ;;  %v81_v59 = vld [vmem:[#allocation5 + $0x120] sm:$0xff]  ;;  %v83_v60 = vld [vmem:[#allocation5 + $0x130] sm:$0xff] }
  0x34   :  { %v128_v58 = vpack.c.bf16 %v84_v56, %v82_v55  ;;  %v86_v61 = vld [vmem:[#allocation5 + $0x148] sm:$0xff]  ;;  %v88_v62 = vld [vmem:[#allocation5 + $0x158] sm:$0xff]  ;;  %v127_v63 = vpack.c.bf16 %v83_v60, %v81_v59  ;;  %v85_v1 = vld [vmem:[#allocation5 + $0x140] sm:$0xff] }
  0x35   :  { %v130_v0 = vpack.c.bf16 %v88_v62, %v86_v61  ;;  %v87_v2 = vld [vmem:[#allocation5 + $0x150] sm:$0xff]  ;;  %v90_v3 = vld [vmem:[#allocation5 + $0x168] sm:$0xff]  ;;  %v92_v4 = vld [vmem:[#allocation5 + $0x178] sm:$0xff] }
  0x36   :  { %160 = vmatpush1.bf16.msra.mxu0 %v115_v25  ;;  %v129_v5 = vpack.c.bf16 %v87_v2, %v85_v1  ;;  %v132_v6 = vpack.c.bf16 %v92_v4, %v90_v3  ;;  %v89_v7 = vld [vmem:[#allocation5 + $0x160] sm:$0xff]  ;;  %v91_v8 = vld [vmem:[#allocation5 + $0x170] sm:$0xff]  ;;  %v94_v9 = vld [vmem:[#allocation5 + $0x188] sm:$0xff] }
  0x37   :  { %161 = vmatprep.subr.bf16.mxu0 %v118_v26  ;;  %v96_v10 = vld [vmem:[#allocation5 + $0x198] sm:$0xff]  ;;  %v131_v11 = vpack.c.bf16 %v91_v8, %v89_v7  ;;  %v93_v13 = vld [vmem:[#allocation5 + $0x180] sm:$0xff]  ;;  %v95_v14 = vld [vmem:[#allocation5 + $0x190] sm:$0xff] }
  0x38   :  { %v134_v12 = vpack.c.bf16 %v96_v10, %v94_v9  ;;  %v98_v15 = vld [vmem:[#allocation5 + $0x1a8] sm:$0xff]  ;;  %v100_v16 = vld [vmem:[#allocation5 + $0x1b8] sm:$0xff]  ;;  %v133_v17 = vpack.c.bf16 %v95_v14, %v93_v13  ;;  %v97_v19 = vld [vmem:[#allocation5 + $0x1a0] sm:$0xff] }
  0x39   :  { %v136_v18 = vpack.c.bf16 %v100_v16, %v98_v15  ;;  %v99_v20 = vld [vmem:[#allocation5 + $0x1b0] sm:$0xff]  ;;  %v102_v21 = vld [vmem:[#allocation5 + $0x1c8] sm:$0xff]  ;;  %v104_v22 = vld [vmem:[#allocation5 + $0x1d8] sm:$0xff] }
  0x3a   :  { %162 = vmatpush1.bf16.msra.mxu0 %v117_v31  ;;  %v135_v23 = vpack.c.bf16 %v99_v20, %v97_v19  ;;  %v138_v24 = vpack.c.bf16 %v104_v22, %v102_v21  ;;  %v101_v25 = vld [vmem:[#allocation5 + $0x1c0] sm:$0xff]  ;;  %v103_v26 = vld [vmem:[#allocation5 + $0x1d0] sm:$0xff]  ;;  %v106_v27 = vld [vmem:[#allocation5 + $0x1e8] sm:$0xff] }
  0x3b   :  { %163 = vmatprep.subr.bf16.mxu0 %v120_v32  ;;  %v108_v28 = vld [vmem:[#allocation5 + $0x1f8] sm:$0xff]  ;;  %v137_v29 = vpack.c.bf16 %v103_v26, %v101_v25  ;;  %v105_v31 = vld [vmem:[#allocation5 + $0x1e0] sm:$0xff]  ;;  %v107_v32 = vld [vmem:[#allocation5 + $0x1f0] sm:$0xff] }
  0x3c   :  { %v140_v30 = vpack.c.bf16 %v108_v28, %v106_v27  ;;  %v139_v33 = vpack.c.bf16 %v107_v32, %v105_v31  ;;  %v41_v34 = vld [vmem:[#allocation2] sm:$0xff] }
  0x3d   :  { %v43_v35 = vpack.c.bf16 %v41_v34, %v41_v34  ;;  %v141_v39 = vld [vmem:[%s384_s2] sm:$0x3]  ;;  %s315_s2 = smov [#allocation7]  }
  0x3e   :  { %164 = vmatpush1.bf16.msra.mxu0 %v119_v37  ;;  %v144_v37 = vshrl.u32 %v143_v36, 7  ;;  %s214_s11 = sshll.u32 %s315_s2, 4  ;;  %s215_s11 = int_to_ptr.vmem [resolvable:$true] %s214_s11 }
  0x3f   :  { %165 = vmatprep.subr.bf16.mxu0 %v122_v38  ;;  %s283_s12 = scalar_lea.vmem %s215_s11, 256  ;;  %p288_p3 = scmp.lt.s32.totalorder %s215_s11, %s215_s11 }
  0x40   :  { %v145_v38 = vsub.s32 0, %v144_v37  ;;  %v149_v40 = vsub.s32 1, %v144_v37  ;;  %p284_p2 = scmp.ne.s32.totalorder %s215_s11, %s283_s12  ;;  %p289_p4 = scmp.lt.s32.totalorder %s283_s12, %s283_s12 }
  0x42   :  { %166 = vmatpush1.bf16.msra.mxu0 %v121_v45  ;;  %v146_v41 = vrot.slane %v141_v39, %v145_v38  ;;  %v150_v42 = vrot.slane %v141_v39, %v149_v40  ;;  %p290_p5 = por %p289_p4, %p288_p3 }
  0x43   :  { %167 = vmatprep.subr.bf16.mxu0 %v124_v46 }
  0x44   :  { %p291_p6 = pnand %p290_p5, %p284_p2 }
  0x46   :  { %168 = vmatpush1.bf16.msra.mxu0 %v123_v51 }
  0x47   :  { %169 = vmatprep.subr.bf16.mxu0 %v126_v52 }
  0x4a   :  { %170 = vmatpush1.bf16.msra.mxu0 %v125_v57 }
  0x4b   :  { %171 = vmatprep.subr.bf16.mxu0 %v128_v58 }
  0x4e   :  { %172 = vmatpush1.bf16.msra.mxu0 %v127_v63 }
  0x4f   :  { %173 = vmatprep.subr.bf16.mxu0 %v130_v0 }
  0x52   :  { %174 = vmatpush1.bf16.msra.mxu0 %v129_v5 }
  0x53   :  { %175 = vmatprep.subr.bf16.mxu0 %v132_v6 }
  0x56   :  { %176 = vmatpush1.bf16.msra.mxu0 %v131_v11 }
  0x57   :  { %177 = vmatprep.subr.bf16.mxu0 %v134_v12 }
  0x5a   :  { %178 = vmatpush1.bf16.msra.mxu0 %v133_v17 }
  0x5b   :  { %179 = vmatprep.subr.bf16.mxu0 %v136_v18 }
  0x5e   :  { %180 = vmatpush1.bf16.msra.mxu0 %v135_v23 }
  0x5f   :  { %181 = vmatprep.subr.bf16.mxu0 %v138_v24 }
  0x62   :  { %182 = vmatpush1.bf16.msra.mxu0 %v137_v29 }
  0x63   :  { %183 = vmatprep.subr.bf16.mxu0 %v140_v30 }
  0x66   :  { %184 = vmatpush1.bf16.msra.mxu0 %v139_v33 }
  0x69   :  { %186 = vmatmul.mubr.bf16.vlgmr.msra.gmra.mrb[0].mxu0 %v43_v35 }
 0x13c   :  { %v187_v43 = vpop.f32.mrb[0].mxu0 }
 0x13d   :  { %v188_v44 = vadd.f32 %v187_v43, %v146_v41  ;;  %v189_v45 = vpop.f32.mrb[1].mxu0 }
 0x13e   :  { %v190_v46 = vadd.f32 %v189_v45, %v150_v42  ;;  %v191_v47 = vpop.f32.mrb[2].mxu0 }
 0x13f   :  { %v224_v48 = vmul.f32 -1.442695, %v188_v44  ;;  %v192_v49 = vpop.f32.mrb[3].mxu0 }
 0x140   :  { %v225_v50 = vmul.f32 -1.442695, %v190_v46 }
 0x141   :  { %231 = vpow2.f32 %v224_v48 }
 0x142   :  { %233 = vpow2.f32 %v225_v50 }
 0x14b   :  { %v232_v51 = vpop.eup %231 }
 0x14c   :  { %v234_v52 = vpop.eup %233  ;;  %v200_v53 = vadd.f32 1.0, %v232_v51 }
 0x14d   :  { %v201_v54 = vadd.f32 1.0, %v234_v52 }
 0x14e   :  { %235 = vrcp.f32 %v200_v53 }
 0x14f   :  { %237 = vrcp.f32 %v201_v54 }
 0x158   :  { %v236_v55 = vpop.eup %235 }
 0x159   :  { %v238_v56 = vpop.eup %237  ;;  %206 = vst [vmem:[#allocation7] sm:$0xff] %v236_v55 }
 0x15a   :  { %207 = vst [vmem:[#allocation7 + $0x8] sm:$0xff] %v238_v56 }
 0x15b   :  { %294 = shalt.err (!%p291_p6)
}
 0x15c   :  { %s295_s15 = scalar_lea.hbm %s385_s3, 256 }
 0x15d   :  { %p296_p7 = scmp.ne.s32.totalorder %s385_s3, %s295_s15  ;;  %p299_p8 = scmp.lt.u32.totalorder %s295_s15, %s385_s3 }
 0x15f   :  { %p301_p9 = pnand %p299_p8, %p296_p7 }
 0x161   :  { %304 = shalt.err (!%p301_p9)
}
 0x162   :  { %217 = dma.vmem_to_hbm [thread:$0]  %s215_s11, 256, %s385_s3, [#allocation4]  }
 0x163   :  { %309 = dma.done.wait [#allocation4], 256  }
 0x164   :  { %310 = vsyncadd [#allocation4], 4294967040 }
 0x165   :  { %221 = vsyncpa [#allocation3], 1 }
 0x166   :  { %222 = vsyncpa [#allocation6], 1 }
 0x167   :  { %223 = vsyncpa [#allocation4], 1 }

</bundles_post_ra>
